<compile_context>
chip_gen: v7x
topology: tpu7x:2x2x1
jax: 0.10.0
libtpu: 0.0.40
codegen_flags: <defaults>
</compile_context>

<pallas_src>
import jax
import jax.numpy as jnp
from jax.experimental import pallas as pl
from jax.experimental.pallas import tpu as pltpu


def _round_up(n, m):
    return ((n + m - 1) // m) * m


def psi_kernel(x_ref, w1_ref, b1_ref, w2_ref, b2_ref, w3_ref, b3_ref, o_ref):
    # Layer 1: bf16 MXU matmul (x arrives pre-cast to bf16), f32 accumulation;
    # bias + ReLU in f32 on the VPU.
    h = jnp.dot(x_ref[...], w1_ref[...], preferred_element_type=jnp.float32)
    h = jnp.maximum(h + b1_ref[...], 0.0)
    # Layer 2
    h = jnp.dot(h.astype(jnp.bfloat16), w2_ref[...],
                preferred_element_type=jnp.float32)
    h = jnp.maximum(h + b2_ref[...], 0.0)
    # Layer 3 (no activation): narrow (block_batch, skill_dim) result computed
    # against the *unpadded* w3, then zero-padded to the lane-dense 128-wide
    # output tile inside VMEM.  The HBM writeback of the whole tile is a
    # full-lane DMA regardless.
    out = jnp.dot(h.astype(jnp.bfloat16), w3_ref[...],
                  preferred_element_type=jnp.float32)
    out = (out + b3_ref[...]).astype(o_ref.dtype)
    skill = out.shape[1]
    if skill == o_ref.shape[1]:
        o_ref[...] = out
    else:
        o_ref[...] = jnp.zeros_like(o_ref)
        o_ref[:, :skill] = out


def prepare_psi_params(w1, b1, w2, b2, w3, b3):
    """One-time device-side param prep: bf16 weights (MXU-native), f32 (1, out)
    biases.  Call once at init / after each optimizer step -- NOT on the
    per-step forward path, so there is no per-call cast/pad HBM traffic."""
    return (
        w1.astype(jnp.bfloat16),
        b1.astype(jnp.float32).reshape(1, -1),
        w2.astype(jnp.bfloat16),
        b2.astype(jnp.float32).reshape(1, -1),
        w3.astype(jnp.bfloat16),
        b3.astype(jnp.float32).reshape(1, -1),
    )


def psi_forward(x, w1, b1, w2, b2, w3, b3, *, max_block_batch=512):
    """Psi MLP forward.  Expects params from `prepare_psi_params`
    (bf16 (in, out) weights, f32 (1, out) biases)."""
    B, num_inputs = x.shape
    hidden = w1.shape[1]
    skill_dim = w3.shape[1]

    # Batch tiling: a single tile for small batches, otherwise 512-row
    # MXU-friendly tiles (multiple of 16 keeps bf16 sublane packing clean).
    if B <= max_block_batch:
        block_batch = max(_round_up(B, 16), 16)
    else:
        block_batch = max_block_batch
    Bp = _round_up(B, block_batch)
    n_steps = Bp // block_batch

    # Lane-dense output tile: skill_dim padded up to a multiple of 128
    # *inside the kernel*; w3/b3 stay unpadded in HBM.
    out_dim = _round_up(skill_dim, 128)

    # Activation-only prep on the hot path (weights were prepared once).
    xp = x if Bp == B else jnp.pad(x, ((0, Bp - B), (0, 0)))
    xp = xp.astype(jnp.bfloat16)

    # Only shard the batch axis across v7x's two TensorCores when there are
    # enough tiles to amortize the duplicated weight fetch.
    semantics = ("parallel",) if n_steps >= 4 else ("arbitrary",)

    # Grid-invariant weight/bias blocks need only a single VMEM buffer.
    w_kw = dict(pipeline_mode=pl.Buffered(1)) if n_steps > 1 else {}

    out = pl.pallas_call(
        psi_kernel,
        out_shape=jax.ShapeDtypeStruct((Bp, out_dim), jnp.float32),
        grid_spec=pltpu.PrefetchScalarGridSpec(
            num_scalar_prefetch=0,
            grid=(n_steps,),
            in_specs=[
                # activations: tiled along batch
                pl.BlockSpec((block_batch, num_inputs), lambda i: (i, 0)),
                # weights / biases: whole array, resident across grid steps
                pl.BlockSpec((num_inputs, hidden), lambda i: (0, 0), **w_kw),
                pl.BlockSpec((1, hidden), lambda i: (0, 0), **w_kw),
                pl.BlockSpec((hidden, hidden), lambda i: (0, 0), **w_kw),
                pl.BlockSpec((1, hidden), lambda i: (0, 0), **w_kw),
                pl.BlockSpec((hidden, skill_dim), lambda i: (0, 0), **w_kw),
                pl.BlockSpec((1, skill_dim), lambda i: (0, 0), **w_kw),
            ],
            out_specs=pl.BlockSpec((block_batch, out_dim), lambda i: (i, 0)),
        ),
        compiler_params=pltpu.CompilerParams(dimension_semantics=semantics),
    )(xp, w1, b1, w2, b2, w3, b3)

    # Strip batch padding and the in-kernel-padded output columns.
    return out[:B, :skill_dim]


def xavier_uniform(key, fan_in, fan_out, gain=1.0):
    # Matches torch.nn.init.xavier_uniform_ (gain=1): U(-a, a), a=sqrt(6/(fi+fo))
    bound = gain * jnp.sqrt(6.0 / (fan_in + fan_out))
    return jax.random.uniform(
        key, (fan_in, fan_out), dtype=jnp.float32, minval=-bound, maxval=bound
    )


def init_psi_params(key, num_inputs, hidden_dim, skill_dim):
    k1, k2, k3 = jax.random.split(key, 3)
    w1 = xavier_uniform(k1, num_inputs, hidden_dim)
    b1 = jnp.zeros((1, hidden_dim), jnp.float32)
    w2 = xavier_uniform(k2, hidden_dim, hidden_dim)
    b2 = jnp.zeros((1, hidden_dim), jnp.float32)
    w3 = xavier_uniform(k3, hidden_dim, skill_dim)
    b3 = jnp.zeros((1, skill_dim), jnp.float32)
    return w1, b1, w2, b2, w3, b3


def psi_forward_ref(x, w1, b1, w2, b2, w3, b3):
    # Plain-JAX reference emulating the kernel's mixed precision:
    # bf16 matmul operands, f32 accumulation, f32 bias/ReLU epilogue.
    # (bf16 weights are a deliberate precision reduction vs the f32 PyTorch
    #  module; parity vs true-f32 is ~1e-2 relative, fine for RL features.)
    def bf(a):
        return a.astype(jnp.bfloat16).astype(jnp.float32)

    h = jnp.maximum(bf(x) @ bf(w1) + b1.reshape(1, -1), 0.0)
    h = jnp.maximum(bf(h) @ bf(w2) + b2.reshape(1, -1), 0.0)
    return bf(h) @ bf(w3) + b3.reshape(1, -1)


if __name__ == "__main__":
    # Small, module-consistent shapes: batch=16 states, num_inputs=32 features,
    # hidden_dim=512 (fixed in the module), latent/skill_dim=8.
    batch = 16
    num_inputs = 32
    hidden_dim = 512
    skill_dim = 8

    key = jax.random.PRNGKey(0)
    k_params, k_x = jax.random.split(key)

    raw_params = init_psi_params(k_params, num_inputs, hidden_dim, skill_dim)
    x = jax.random.normal(k_x, (batch, num_inputs), dtype=jnp.float32)

    # One-time param prep (bf16 weights), off the per-step hot path.
    prepped = jax.block_until_ready(prepare_psi_params(*raw_params))

    psi_fwd = jax.jit(psi_forward)
    out = psi_fwd(x, *prepped)
    out = jax.block_until_ready(out)

    # Sanity check against a plain-JAX reference of the same mixed-precision math.
    ref = psi_forward_ref(x, *raw_params)
    assert out.shape == (batch, skill_dim)
    assert jnp.allclose(out, ref, atol=5e-3, rtol=5e-3), (
        float(jnp.max(jnp.abs(out - ref)))
    )

    print("KERNEL_OK")
</pallas_src>

<mosaic_0001>
module attributes {stable_mosaic.version = 11 : i64} {
  func.func @psi_kernel(%arg0: i32, %arg1: memref<16x32xbf16, #tpu.memory_space<vmem>>, %arg2: memref<32x512xbf16, #tpu.memory_space<vmem>>, %arg3: memref<1x512xf32, #tpu.memory_space<vmem>>, %arg4: memref<512x512xbf16, #tpu.memory_space<vmem>>, %arg5: memref<1x512xf32, #tpu.memory_space<vmem>>, %arg6: memref<512x8xbf16, #tpu.memory_space<vmem>>, %arg7: memref<1x8xf32, #tpu.memory_space<vmem>>, %arg8: memref<16x128xf32, #tpu.memory_space<vmem>>) attributes {dimension_semantics = [#tpu.dimension_semantics<arbitrary>], iteration_bounds = array<i64: 1>, scalar_prefetch = 0 : i64, scratch_operands = 0 : i64, tpu.core_type = #tpu.core_type<tc>, window_params = [{transform_indices = @transform_0, window_bounds = array<i64: 16, 32>}, {pipeline_mode = #tpu.pipeline_mode<synchronous>, transform_indices = @transform_1, window_bounds = array<i64: 32, 512>}, {pipeline_mode = #tpu.pipeline_mode<synchronous>, transform_indices = @transform_2, window_bounds = array<i64: 1, 512>}, {pipeline_mode = #tpu.pipeline_mode<synchronous>, transform_indices = @transform_3, window_bounds = array<i64: 512, 512>}, {pipeline_mode = #tpu.pipeline_mode<synchronous>, transform_indices = @transform_4, window_bounds = array<i64: 1, 512>}, {pipeline_mode = #tpu.pipeline_mode<synchronous>, transform_indices = @transform_5, window_bounds = array<i64: 512, 8>}, {pipeline_mode = #tpu.pipeline_mode<synchronous>, transform_indices = @transform_6, window_bounds = array<i64: 1, 8>}, {transform_indices = @transform_7, window_bounds = array<i64: 16, 128>}]} {
    %c0 = arith.constant 0 : index
    %c0_0 = arith.constant 0 : index
    %0 = vector.load %arg1[%c0, %c0_0] : memref<16x32xbf16, #tpu.memory_space<vmem>>, vector<16x32xbf16>
    %c0_1 = arith.constant 0 : index
    %c0_2 = arith.constant 0 : index
    %1 = vector.load %arg2[%c0_1, %c0_2] : memref<32x512xbf16, #tpu.memory_space<vmem>>, vector<32x512xbf16>
    %cst = arith.constant dense<0.000000e+00> : vector<16x512xf32>
    %2 = tpu.matmul %0, %1, %cst {dimension_numbers = #tpu.dot_dimension_numbers<[1], [0], [0], [1], [0, 0, 1, 1], [], []>} : vector<16x32xbf16>, vector<32x512xbf16>, vector<16x512xf32> -> vector<16x512xf32>
    %c0_3 = arith.constant 0 : index
    %c0_4 = arith.constant 0 : index
    %3 = vector.load %arg3[%c0_3, %c0_4] : memref<1x512xf32, #tpu.memory_space<vmem>>, vector<1x512xf32>
    %4 = vector.broadcast %3 : vector<1x512xf32> to vector<16x512xf32>
    %5 = arith.addf %2, %4 : vector<16x512xf32>
    %cst_5 = arith.constant 0.000000e+00 : f32
    %6 = vector.broadcast %cst_5 : f32 to vector<16x512xf32>
    %7 = arith.maximumf %5, %6 : vector<16x512xf32>
    %8 = arith.truncf %7 : vector<16x512xf32> to vector<16x512xbf16>
    %c0_6 = arith.constant 0 : index
    %c0_7 = arith.constant 0 : index
    %9 = vector.load %arg4[%c0_6, %c0_7] : memref<512x512xbf16, #tpu.memory_space<vmem>>, vector<512x512xbf16>
    %cst_8 = arith.constant dense<0.000000e+00> : vector<16x512xf32>
    %10 = tpu.matmul %8, %9, %cst_8 {dimension_numbers = #tpu.dot_dimension_numbers<[1], [0], [0], [1], [0, 0, 1, 1], [], []>} : vector<16x512xbf16>, vector<512x512xbf16>, vector<16x512xf32> -> vector<16x512xf32>
    %c0_9 = arith.constant 0 : index
    %c0_10 = arith.constant 0 : index
    %11 = vector.load %arg5[%c0_9, %c0_10] : memref<1x512xf32, #tpu.memory_space<vmem>>, vector<1x512xf32>
    %12 = vector.broadcast %11 : vector<1x512xf32> to vector<16x512xf32>
    %13 = arith.addf %10, %12 : vector<16x512xf32>
    %cst_11 = arith.constant 0.000000e+00 : f32
    %14 = vector.broadcast %cst_11 : f32 to vector<16x512xf32>
    %15 = arith.maximumf %13, %14 : vector<16x512xf32>
    %16 = arith.truncf %15 : vector<16x512xf32> to vector<16x512xbf16>
    %c0_12 = arith.constant 0 : index
    %c0_13 = arith.constant 0 : index
    %17 = vector.load %arg6[%c0_12, %c0_13] : memref<512x8xbf16, #tpu.memory_space<vmem>>, vector<512x8xbf16>
    %cst_14 = arith.constant dense<0.000000e+00> : vector<16x8xf32>
    %18 = tpu.matmul %16, %17, %cst_14 {dimension_numbers = #tpu.dot_dimension_numbers<[1], [0], [0], [1], [0, 0, 1, 1], [], []>} : vector<16x512xbf16>, vector<512x8xbf16>, vector<16x8xf32> -> vector<16x8xf32>
    %c0_15 = arith.constant 0 : index
    %c0_16 = arith.constant 0 : index
    %19 = vector.load %arg7[%c0_15, %c0_16] : memref<1x8xf32, #tpu.memory_space<vmem>>, vector<1x8xf32>
    %20 = vector.broadcast %19 : vector<1x8xf32> to vector<16x8xf32>
    %21 = arith.addf %18, %20 : vector<16x8xf32>
    %cst_17 = arith.constant 0.000000e+00 : f32
    %22 = vector.broadcast %cst_17 : f32 to vector<16x128xf32>
    %c0_18 = arith.constant 0 : index
    %c0_19 = arith.constant 0 : index
    %23 = vector.load %arg8[%c0_18, %c0_19] : memref<16x128xf32, #tpu.memory_space<vmem>>, vector<16x128xf32>
    tpu.vector_store %arg8[%c0_18, %c0_19], %22 {strides = array<i32>} : memref<16x128xf32, #tpu.memory_space<vmem>>, vector<16x128xf32>,
    %c0_20 = arith.constant 0 : index
    %c0_21 = arith.constant 0 : index
    %24 = vector.load %arg8[%c0_20, %c0_21] : memref<16x128xf32, #tpu.memory_space<vmem>>, vector<16x8xf32>
    tpu.vector_store %arg8[%c0_20, %c0_21], %21 {strides = array<i32>} : memref<16x128xf32, #tpu.memory_space<vmem>>, vector<16x8xf32>,
    return
  }
  func.func @transform_0(%arg0: i32) -> (i32, i32) {
    %c0_i32 = arith.constant 0 : i32
    %c0_i32_0 = arith.constant 0 : i32
    return %arg0, %c0_i32 : i32, i32
  }
  func.func @transform_1(%arg0: i32) -> (i32, i32) {
    %c0_i32 = arith.constant 0 : i32
    %c0_i32_0 = arith.constant 0 : i32
    %c0_i32_1 = arith.constant 0 : i32
    return %c0_i32, %c0_i32_0 : i32, i32
  }
  func.func @transform_2(%arg0: i32) -> (i32, i32) {
    %c0_i32 = arith.constant 0 : i32
    %c0_i32_0 = arith.constant 0 : i32
    %c0_i32_1 = arith.constant 0 : i32
    return %c0_i32, %c0_i32_0 : i32, i32
  }
  func.func @transform_3(%arg0: i32) -> (i32, i32) {
    %c0_i32 = arith.constant 0 : i32
    %c0_i32_0 = arith.constant 0 : i32
    %c0_i32_1 = arith.constant 0 : i32
    return %c0_i32, %c0_i32_0 : i32, i32
  }
  func.func @transform_4(%arg0: i32) -> (i32, i32) {
    %c0_i32 = arith.constant 0 : i32
    %c0_i32_0 = arith.constant 0 : i32
    %c0_i32_1 = arith.constant 0 : i32
    return %c0_i32, %c0_i32_0 : i32, i32
  }
  func.func @transform_5(%arg0: i32) -> (i32, i32) {
    %c0_i32 = arith.constant 0 : i32
    %c0_i32_0 = arith.constant 0 : i32
    %c0_i32_1 = arith.constant 0 : i32
    return %c0_i32, %c0_i32_0 : i32, i32
  }
  func.func @transform_6(%arg0: i32) -> (i32, i32) {
    %c0_i32 = arith.constant 0 : i32
    %c0_i32_0 = arith.constant 0 : i32
    %c0_i32_1 = arith.constant 0 : i32
    return %c0_i32, %c0_i32_0 : i32, i32
  }
  func.func @transform_7(%arg0: i32) -> (i32, i32) {
    %c0_i32 = arith.constant 0 : i32
    %c0_i32_0 = arith.constant 0 : i32
    return %arg0, %c0_i32 : i32, i32
  }
}

</mosaic_0001>

<bundles_post_ra>
// kernel: psi_forward.1
= control target key start
LH: loop header
LB: loop body
LE: loop exit
PB: predicated region body
PF: predicated region fallthrough
CT: control target
= control target key end

     0   :  { %12 = vsyncpa [#allocation3], 0  ;;  %s2047_s24 = smov [#allocation2]   ;;  %s2276_s0 = inlined_call_operand.vmem [shape: bf16[16,32], index: 0, kind: input, shape index: {}]   ;;  %s2277_s1 = inlined_call_operand.vmem [shape: bf16[32,512], index: 1, kind: input, shape index: {}]   ;;  %s2278_s2 = inlined_call_operand.vmem [shape: f32[1,512], index: 2, kind: input, shape index: {}]   ;;  %s2279_s3 = inlined_call_operand.hbm [shape: bf16[512,512], index: 3, kind: input, shape index: {}]   ;;  %s2280_s4 = inlined_call_operand.vmem [shape: f32[1,512], index: 4, kind: input, shape index: {}]   ;;  %s2281_s5 = inlined_call_operand.vmem [shape: bf16[512,8], index: 5, kind: input, shape index: {}]   ;;  %s2282_s6 = inlined_call_operand.vmem [shape: f32[1,8], index: 6, kind: input, shape index: {}]   ;;  %s2283_s7 = inlined_call_operand.vmem [shape: f32[16,128], index: 7, kind: output, shape index: {}]  }
   0x1   :  { %s24_s25 = sshll.u32 %s2047_s24, 4  ;;  %s2023_s28 = scalar_lea.hbm %s2279_s3, 16384  ;;  %s25_s25 = int_to_ptr.vmem [resolvable:$true] %s24_s25 }
   0x2   :  { %p2024_p0 = scmp.ne.s32.totalorder %s2279_s3, %s2023_s28  ;;  %p2027_p1 = scmp.lt.u32.totalorder %s2023_s28, %s2279_s3 }
   0x4   :  { %p2029_p2 = pnand %p2027_p1, %p2024_p0 }
   0x6   :  { %2032 = shalt.err (!%p2029_p2)
}
   0x7   :  { %s2033_s10 = scalar_lea.vmem %s25_s25, 16384  ;;  %p2038_p4 = scmp.lt.s32.totalorder %s25_s25, %s25_s25 }
   0x8   :  { %p2034_p3 = scmp.ne.s32.totalorder %s25_s25, %s2033_s10  ;;  %p2039_p5 = scmp.lt.s32.totalorder %s2033_s10, %s2033_s10 }
   0xa   :  { %p2040_p6 = por %p2039_p5, %p2038_p4 }
   0xc   :  { %p2041_p7 = pnand %p2040_p6, %p2034_p3 }
   0xe   :  { %2044 = shalt.err (!%p2041_p7)
}
   0xf   :  { %s2048_s11 = smov 256   ;;  %s2049_s12 = smov 16  }
  0x10   :  { %30 = dma.hbm_to_vmem [thread:$0]  %s2279_s3, 16384, %s25_s25, [#allocation3], %s2048_s11, %s2048_s11, %s2049_s12  }
  0x11   :  { %2045 = dma.done.wait [#allocation3], 16384  }
  0x12   :  { %2046 = vsyncadd [#allocation3], 4294950912  ;;  %v2050_v0 = vmov 0   ;;  %v1786_v1 = vld [vmem:[%s2277_s1 + $0x4] ss:$16 sps:$4 sm:$0xff]   ;;  %vm118_vm0 = vcmask 261120  }
  0x13   :  { %154 = vmatprep.mubr.bf16.mxu0 %v2050_v0  ;;  %197 = vmatprep.mubr.bf16.mxu1 %v2050_v0  ;;  %v1788_v2 = vld [vmem:[%s2277_s1] ss:$16 sps:$4 sm:$0xff]   ;;  %v1789_v3 = vld [vmem:[%s2277_s1 + $0x24] ss:$16 sps:$4 sm:$0xff]   ;;  %v1793_v6 = vld [vmem:[%s2277_s1 + $0xc] ss:$16 sps:$4 sm:$0xff]  }
  0x14   :  { %122 = vmatprep.subr.bf16.mxu0 %v1786_v1  ;;  %v1791_v4 = vld [vmem:[%s2277_s1 + $0x20] ss:$16 sps:$4 sm:$0xff]   ;;  %v1795_v7 = vld [vmem:[%s2277_s1 + $0x8] ss:$16 sps:$4 sm:$0xff]   ;;  %v1796_v8 = vld [vmem:[%s2277_s1 + $0x2c] ss:$16 sps:$4 sm:$0xff]   ;;  %165 = vmatprep.subr.bf16.mxu1 %v1793_v6 }
  0x15   :  { %123 = vmatpush1.bf16.msra.mxu0 %v1788_v2  ;;  %v1792_v5 = vld [vmem:[%s2276_s0] sm:$0xff]   ;;  %v1798_v9 = vld [vmem:[%s2277_s1 + $0x28] ss:$16 sps:$4 sm:$0xff]   ;;  %166 = vmatpush1.bf16.msra.mxu1 %v1795_v7  ;;  %v1804_v12 = vld [vmem:[#allocation2 + $0xc] ss:$16 sps:$4 sm:$0xff]   ;;  %vm1541_vm1 = vcmask 64512  }
  0x16   :  { %124 = vmatprep.subr.bf16.mxu0 %v1789_v3  ;;  %v1799_v10 = vld [vmem:[#allocation2] ss:$16 sps:$4 sm:$0xff]   ;;  %v1801_v11 = vld [vmem:[#allocation2 + $0x4] ss:$16 sps:$4 sm:$0xff]   ;;  %167 = vmatprep.subr.bf16.mxu1 %v1796_v8  ;;  %v1802_v14 = vld [vmem:[#allocation2 + $0x8] ss:$16 sps:$4 sm:$0xff]  }
  0x17   :  { %v1807_v13 = vld [vmem:[#allocation2 + $0x24] ss:$16 sps:$4 sm:$0xff]   ;;  %v1805_v15 = vld [vmem:[#allocation2 + $0x20] ss:$16 sps:$4 sm:$0xff]   ;;  %v1810_v16 = vld [vmem:[#allocation2 + $0x2c] ss:$16 sps:$4 sm:$0xff]  }
  0x18   :  { %v1813_v17 = vld [vmem:[#allocation2 + $0x44] ss:$16 sps:$4 sm:$0xff]   ;;  %v1808_v18 = vld [vmem:[#allocation2 + $0x28] ss:$16 sps:$4 sm:$0xff]   ;;  %v1811_v19 = vld [vmem:[#allocation2 + $0x40] ss:$16 sps:$4 sm:$0xff]  }
  0x19   :  { %125 = vmatpush1.bf16.msra.mxu0 %v1791_v4  ;;  %168 = vmatpush1.bf16.msra.mxu1 %v1798_v9  ;;  %v1816_v20 = vld [vmem:[#allocation2 + $0x4c] ss:$16 sps:$4 sm:$0xff]   ;;  %v1819_v21 = vld [vmem:[#allocation2 + $0x64] ss:$16 sps:$4 sm:$0xff]   ;;  %v1814_v22 = vld [vmem:[#allocation2 + $0x48] ss:$16 sps:$4 sm:$0xff]  }
  0x1a   :  { %1010 = vmatprep.subr.bf16.mxu0 %v1801_v11  ;;  %1096 = vmatprep.subr.bf16.mxu1 %v1804_v12  ;;  %v1817_v23 = vld [vmem:[#allocation2 + $0x60] ss:$16 sps:$4 sm:$0xff]   ;;  %v1822_v24 = vld [vmem:[#allocation2 + $0x6c] ss:$16 sps:$4 sm:$0xff]   ;;  %v1825_v25 = vld [vmem:[#allocation2 + $0x84] ss:$16 sps:$4 sm:$0xff]   ;;  %v53_v12 = vlaneseq }
  0x1b   :  { %v1820_v26 = vld [vmem:[#allocation2 + $0x68] ss:$16 sps:$4 sm:$0xff]   ;;  %v1823_v27 = vld [vmem:[#allocation2 + $0x80] ss:$16 sps:$4 sm:$0xff]   ;;  %v1828_v28 = vld [vmem:[#allocation2 + $0x8c] ss:$16 sps:$4 sm:$0xff]  }
  0x1c   :  { %1558 = vmatmul.mubr.msk.bf16.vlgmr.msra.gmra.mrb[0].mxu0 %vm118_vm0, %v1792_v5  ;;  %1559 = vmatmul.mubr.msk.bf16.vlgmr.msra.gmra.mrb[0].mxu1 %vm118_vm0, %v1792_v5  ;;  %v1831_v29 = vld [vmem:[#allocation2 + $0xa4] ss:$16 sps:$4 sm:$0xff]   ;;  %v1826_v30 = vld [vmem:[#allocation2 + $0x88] ss:$16 sps:$4 sm:$0xff]   ;;  %v1829_v31 = vld [vmem:[#allocation2 + $0xa0] ss:$16 sps:$4 sm:$0xff]  }
  0x1d   :  { %1011 = vmatpush1.bf16.msra.mxu0 %v1799_v10  ;;  %1097 = vmatpush1.bf16.msra.mxu1 %v1802_v14  ;;  %v1834_v32 = vld [vmem:[#allocation2 + $0xac] ss:$16 sps:$4 sm:$0xff]   ;;  %v1837_v33 = vld [vmem:[#allocation2 + $0xc4] ss:$16 sps:$4 sm:$0xff]   ;;  %v1832_v34 = vld [vmem:[#allocation2 + $0xa8] ss:$16 sps:$4 sm:$0xff]  }
  0x1e   :  { %1012 = vmatprep.subr.bf16.mxu0 %v1807_v13  ;;  %1098 = vmatprep.subr.bf16.mxu1 %v1810_v16  ;;  %v1835_v35 = vld [vmem:[#allocation2 + $0xc0] ss:$16 sps:$4 sm:$0xff]   ;;  %v1840_v36 = vld [vmem:[#allocation2 + $0xcc] ss:$16 sps:$4 sm:$0xff]   ;;  %v1843_v37 = vld [vmem:[#allocation2 + $0xe4] ss:$16 sps:$4 sm:$0xff]  }
  0x1f   :  { %v1838_v38 = vld [vmem:[#allocation2 + $0xc8] ss:$16 sps:$4 sm:$0xff]   ;;  %v1841_v39 = vld [vmem:[#allocation2 + $0xe0] ss:$16 sps:$4 sm:$0xff]   ;;  %v1846_v40 = vld [vmem:[#allocation2 + $0xec] ss:$16 sps:$4 sm:$0xff]  }
  0x20   :  { %v1849_v41 = vld [vmem:[#allocation2 + $0x104] ss:$16 sps:$4 sm:$0xff]   ;;  %v1844_v42 = vld [vmem:[#allocation2 + $0xe8] ss:$16 sps:$4 sm:$0xff]   ;;  %v1847_v43 = vld [vmem:[#allocation2 + $0x100] ss:$16 sps:$4 sm:$0xff]  }
  0x21   :  { %1013 = vmatpush1.bf16.msra.mxu0 %v1805_v15  ;;  %1099 = vmatpush1.bf16.msra.mxu1 %v1808_v18  ;;  %v1852_v44 = vld [vmem:[#allocation2 + $0x10c] ss:$16 sps:$4 sm:$0xff]   ;;  %v1855_v45 = vld [vmem:[#allocation2 + $0x124] ss:$16 sps:$4 sm:$0xff]   ;;  %v1850_v46 = vld [vmem:[#allocation2 + $0x108] ss:$16 sps:$4 sm:$0xff]  }
  0x22   :  { %1014 = vmatprep.subr.bf16.mxu0 %v1813_v17  ;;  %1100 = vmatprep.subr.bf16.mxu1 %v1816_v20  ;;  %v1853_v47 = vld [vmem:[#allocation2 + $0x120] ss:$16 sps:$4 sm:$0xff]   ;;  %v1858_v48 = vld [vmem:[#allocation2 + $0x12c] ss:$16 sps:$4 sm:$0xff]   ;;  %v1861_v49 = vld [vmem:[#allocation2 + $0x144] ss:$16 sps:$4 sm:$0xff]  }
  0x23   :  { %v1856_v50 = vld [vmem:[#allocation2 + $0x128] ss:$16 sps:$4 sm:$0xff]   ;;  %v1859_v51 = vld [vmem:[#allocation2 + $0x140] ss:$16 sps:$4 sm:$0xff]   ;;  %v1864_v52 = vld [vmem:[#allocation2 + $0x14c] ss:$16 sps:$4 sm:$0xff]  }
  0x24   :  { %v1867_v53 = vld [vmem:[#allocation2 + $0x164] ss:$16 sps:$4 sm:$0xff]   ;;  %v1862_v54 = vld [vmem:[#allocation2 + $0x148] ss:$16 sps:$4 sm:$0xff]   ;;  %v1865_v55 = vld [vmem:[#allocation2 + $0x160] ss:$16 sps:$4 sm:$0xff]  }
  0x25   :  { %1015 = vmatpush1.bf16.msra.mxu0 %v1811_v19  ;;  %1101 = vmatpush1.bf16.msra.mxu1 %v1814_v22  ;;  %v1870_v56 = vld [vmem:[#allocation2 + $0x16c] ss:$16 sps:$4 sm:$0xff]   ;;  %v1873_v57 = vld [vmem:[#allocation2 + $0x184] ss:$16 sps:$4 sm:$0xff]   ;;  %v1868_v58 = vld [vmem:[#allocation2 + $0x168] ss:$16 sps:$4 sm:$0xff]  }
  0x26   :  { %1016 = vmatprep.subr.bf16.mxu0 %v1819_v21  ;;  %1102 = vmatprep.subr.bf16.mxu1 %v1822_v24  ;;  %v1871_v59 = vld [vmem:[#allocation2 + $0x180] ss:$16 sps:$4 sm:$0xff]   ;;  %v1876_v60 = vld [vmem:[#allocation2 + $0x18c] ss:$16 sps:$4 sm:$0xff]   ;;  %v1879_v61 = vld [vmem:[#allocation2 + $0x1a4] ss:$16 sps:$4 sm:$0xff]  }
  0x27   :  { %v1874_v62 = vld [vmem:[#allocation2 + $0x188] ss:$16 sps:$4 sm:$0xff]   ;;  %v1877_v63 = vld [vmem:[#allocation2 + $0x1a0] ss:$16 sps:$4 sm:$0xff]   ;;  %v1882_v0 = vld [vmem:[#allocation2 + $0x1ac] ss:$16 sps:$4 sm:$0xff]  }
  0x28   :  { %v1880_v1 = vld [vmem:[#allocation2 + $0x1a8] ss:$16 sps:$4 sm:$0xff]   ;;  %v1885_v2 = vld [vmem:[#allocation2 + $0x1c4] ss:$16 sps:$4 sm:$0xff]   ;;  %v1888_v3 = vld [vmem:[#allocation2 + $0x1cc] ss:$16 sps:$4 sm:$0xff]  }
  0x29   :  { %1017 = vmatpush1.bf16.msra.mxu0 %v1817_v23  ;;  %1103 = vmatpush1.bf16.msra.mxu1 %v1820_v26  ;;  %v1883_v4 = vld [vmem:[#allocation2 + $0x1c0] ss:$16 sps:$4 sm:$0xff]   ;;  %v1886_v5 = vld [vmem:[#allocation2 + $0x1c8] ss:$16 sps:$4 sm:$0xff]   ;;  %v1891_v6 = vld [vmem:[#allocation2 + $0x1e4] ss:$16 sps:$4 sm:$0xff]  }
  0x2a   :  { %1018 = vmatprep.subr.bf16.mxu0 %v1825_v25  ;;  %1104 = vmatprep.subr.bf16.mxu1 %v1828_v28  ;;  %v1894_v7 = vld [vmem:[#allocation2 + $0x1ec] ss:$16 sps:$4 sm:$0xff]   ;;  %v1889_v8 = vld [vmem:[#allocation2 + $0x1e0] ss:$16 sps:$4 sm:$0xff]   ;;  %v1892_v9 = vld [vmem:[#allocation2 + $0x1e8] ss:$16 sps:$4 sm:$0xff]  }
  0x2b   :  { %v1897_v10 = vld [vmem:[#allocation2 + $0x204] ss:$16 sps:$4 sm:$0xff]   ;;  %v1900_v11 = vld [vmem:[#allocation2 + $0x20c] ss:$16 sps:$4 sm:$0xff]   ;;  %v2133_v13 = vshrl.u32 %v53_v12, 7 }
  0x2c   :  { %v51_v15 = vld [vmem:[%s2278_s2] sm:$0xf]  ;;  %v1934_v12 = vld [vmem:[#allocation2 + $0x2c8] ss:$16 sps:$4 sm:$0xff]  }
  0x2d   :  { %1019 = vmatpush1.bf16.msra.mxu0 %v1823_v27  ;;  %1105 = vmatpush1.bf16.msra.mxu1 %v1826_v30  ;;  %v55_v14 = vsub.s32 0, %v2133_v13  ;;  %v59_v16 = vsub.s32 1, %v2133_v13  ;;  %v63_v18 = vsub.s32 2, %v2133_v13  ;;  %v67_v20 = vsub.s32 3, %v2133_v13 }
  0x2e   :  { %1020 = vmatprep.subr.bf16.mxu0 %v1831_v29  ;;  %1106 = vmatprep.subr.bf16.mxu1 %v1834_v32 }
  0x2f   :  { %v56_v17 = vrot.slane %v51_v15, %v55_v14  ;;  %v60_v19 = vrot.slane %v51_v15, %v59_v16  ;;  %v64_v24 = vrot.slane %v51_v15, %v63_v18  ;;  %v68_v27 = vrot.slane %v51_v15, %v67_v20  ;;  %v1939_v15 = vld [vmem:[#allocation2 + $0x2e4] ss:$16 sps:$4 sm:$0xff]  }
  0x31   :  { %1021 = vmatpush1.bf16.msra.mxu0 %v1829_v31  ;;  %1107 = vmatpush1.bf16.msra.mxu1 %v1832_v34 }
  0x32   :  { %1022 = vmatprep.subr.bf16.mxu0 %v1837_v33  ;;  %1108 = vmatprep.subr.bf16.mxu1 %v1840_v36 }
  0x35   :  { %1023 = vmatpush1.bf16.msra.mxu0 %v1835_v35  ;;  %1109 = vmatpush1.bf16.msra.mxu1 %v1838_v38 }
  0x36   :  { %1024 = vmatprep.subr.bf16.mxu0 %v1843_v37  ;;  %1110 = vmatprep.subr.bf16.mxu1 %v1846_v40 }
  0x39   :  { %1025 = vmatpush1.bf16.msra.mxu0 %v1841_v39  ;;  %1111 = vmatpush1.bf16.msra.mxu1 %v1844_v42 }
  0x3a   :  { %1026 = vmatprep.subr.bf16.mxu0 %v1849_v41  ;;  %1112 = vmatprep.subr.bf16.mxu1 %v1852_v44 }
  0x3d   :  { %1027 = vmatpush1.bf16.msra.mxu0 %v1847_v43  ;;  %1113 = vmatpush1.bf16.msra.mxu1 %v1850_v46  ;;  %v1898_v46 = vld [vmem:[#allocation2 + $0x208] ss:$16 sps:$4 sm:$0xff]  }
  0x3e   :  { %1028 = vmatprep.subr.bf16.mxu0 %v1855_v45  ;;  %1114 = vmatprep.subr.bf16.mxu1 %v1858_v48  ;;  %v1895_v45 = vld [vmem:[#allocation2 + $0x200] ss:$16 sps:$4 sm:$0xff]  }
  0x41   :  { %1029 = vmatpush1.bf16.msra.mxu0 %v1853_v47  ;;  %1115 = vmatpush1.bf16.msra.mxu1 %v1856_v50  ;;  %v1906_v50 = vld [vmem:[#allocation2 + $0x22c] ss:$16 sps:$4 sm:$0xff]  }
  0x42   :  { %1030 = vmatprep.subr.bf16.mxu0 %v1861_v49  ;;  %1116 = vmatprep.subr.bf16.mxu1 %v1864_v52  ;;  %v1903_v49 = vld [vmem:[#allocation2 + $0x224] ss:$16 sps:$4 sm:$0xff]  }
  0x45   :  { %1031 = vmatpush1.bf16.msra.mxu0 %v1859_v51  ;;  %1117 = vmatpush1.bf16.msra.mxu1 %v1862_v54  ;;  %v1901_v54 = vld [vmem:[#allocation2 + $0x220] ss:$16 sps:$4 sm:$0xff]  }
  0x46   :  { %1032 = vmatprep.subr.bf16.mxu0 %v1867_v53  ;;  %1118 = vmatprep.subr.bf16.mxu1 %v1870_v56 }
  0x49   :  { %1033 = vmatpush1.bf16.msra.mxu0 %v1865_v55  ;;  %1119 = vmatpush1.bf16.msra.mxu1 %v1868_v58  ;;  %v1904_v55 = vld [vmem:[#allocation2 + $0x228] ss:$16 sps:$4 sm:$0xff]   ;;  %v1912_v58 = vld [vmem:[#allocation2 + $0x24c] ss:$16 sps:$4 sm:$0xff]  }
  0x4a   :  { %1034 = vmatprep.subr.bf16.mxu0 %v1873_v57  ;;  %1120 = vmatprep.subr.bf16.mxu1 %v1876_v60  ;;  %v1909_v57 = vld [vmem:[#allocation2 + $0x244] ss:$16 sps:$4 sm:$0xff]   ;;  %v1910_v60 = vld [vmem:[#allocation2 + $0x248] ss:$16 sps:$4 sm:$0xff]  }
  0x4d   :  { %1035 = vmatpush1.bf16.msra.mxu0 %v1871_v59  ;;  %1121 = vmatpush1.bf16.msra.mxu1 %v1874_v62  ;;  %v1907_v59 = vld [vmem:[#allocation2 + $0x240] ss:$16 sps:$4 sm:$0xff]   ;;  %v1918_v62 = vld [vmem:[#allocation2 + $0x26c] ss:$16 sps:$4 sm:$0xff]  }
  0x4e   :  { %1036 = vmatprep.subr.bf16.mxu0 %v1879_v61  ;;  %1122 = vmatprep.subr.bf16.mxu1 %v1882_v0  ;;  %v1915_v61 = vld [vmem:[#allocation2 + $0x264] ss:$16 sps:$4 sm:$0xff]   ;;  %v1916_v0 = vld [vmem:[#allocation2 + $0x268] ss:$16 sps:$4 sm:$0xff]  }
  0x51   :  { %1037 = vmatpush1.bf16.msra.mxu0 %v1877_v63  ;;  %1123 = vmatpush1.bf16.msra.mxu1 %v1880_v1  ;;  %v1913_v63 = vld [vmem:[#allocation2 + $0x260] ss:$16 sps:$4 sm:$0xff]   ;;  %v1921_v1 = vld [vmem:[#allocation2 + $0x284] ss:$16 sps:$4 sm:$0xff]  }
  0x52   :  { %1038 = vmatprep.subr.bf16.mxu0 %v1885_v2  ;;  %1124 = vmatprep.subr.bf16.mxu1 %v1888_v3  ;;  %v1924_v2 = vld [vmem:[#allocation2 + $0x28c] ss:$16 sps:$4 sm:$0xff]   ;;  %v1919_v3 = vld [vmem:[#allocation2 + $0x280] ss:$16 sps:$4 sm:$0xff]  }
  0x55   :  { %1039 = vmatpush1.bf16.msra.mxu0 %v1883_v4  ;;  %1125 = vmatpush1.bf16.msra.mxu1 %v1886_v5  ;;  %v1922_v4 = vld [vmem:[#allocation2 + $0x288] ss:$16 sps:$4 sm:$0xff]   ;;  %v1927_v5 = vld [vmem:[#allocation2 + $0x2a4] ss:$16 sps:$4 sm:$0xff]  }
  0x56   :  { %1040 = vmatprep.subr.bf16.mxu0 %v1891_v6  ;;  %1126 = vmatprep.subr.bf16.mxu1 %v1894_v7  ;;  %v1930_v6 = vld [vmem:[#allocation2 + $0x2ac] ss:$16 sps:$4 sm:$0xff]   ;;  %v1925_v7 = vld [vmem:[#allocation2 + $0x2a0] ss:$16 sps:$4 sm:$0xff]  }
  0x59   :  { %1041 = vmatpush1.bf16.msra.mxu0 %v1889_v8  ;;  %1127 = vmatpush1.bf16.msra.mxu1 %v1892_v9  ;;  %v1928_v8 = vld [vmem:[#allocation2 + $0x2a8] ss:$16 sps:$4 sm:$0xff]   ;;  %v1933_v9 = vld [vmem:[#allocation2 + $0x2c4] ss:$16 sps:$4 sm:$0xff]  }
  0x5a   :  { %1053 = vmatprep.subr.bf16.mxu0 %v1897_v10  ;;  %1139 = vmatprep.subr.bf16.mxu1 %v1900_v11  ;;  %v1936_v10 = vld [vmem:[#allocation2 + $0x2cc] ss:$16 sps:$4 sm:$0xff]   ;;  %v1931_v11 = vld [vmem:[#allocation2 + $0x2c0] ss:$16 sps:$4 sm:$0xff]  }
  0xef   :  { %v156_v21 = vpop.f32.mrb[0].mxu0  ;;  %v199_v31 = vpop.f32.mrb[0].mxu1 }
  0xf0   :  { %v157_v22 = vadd.f32 %v156_v21, %v56_v17  ;;  %v158_v23 = vpop.f32.mrb[1].mxu0  ;;  %v200_v34 = vadd.f32 %v199_v31, %v64_v24  ;;  %v201_v35 = vpop.f32.mrb[1].mxu1  ;;  %v1940_v21 = vld [vmem:[#allocation2 + $0x2e8] ss:$16 sps:$4 sm:$0xff]   ;;  %v1960_v31 = vld [vmem:[#allocation2 + $0x34c] ss:$16 sps:$4 sm:$0xff]  }
  0xf1   :  { %v159_v25 = vadd.f32 %v158_v23, %v60_v19  ;;  %v160_v26 = vpop.f32.mrb[2].mxu0  ;;  %v202_v38 = vadd.f32 %v201_v35, %v68_v27  ;;  %v203_v39 = vpop.f32.mrb[2].mxu1  ;;  %v1948_v23 = vld [vmem:[#allocation2 + $0x30c] ss:$16 sps:$4 sm:$0xff]  }
  0xf2   :  { %v161_v28 = vadd.f32 %v160_v26, %v56_v17  ;;  %v162_v29 = vpop.f32.mrb[3].mxu0  ;;  %v208_v32 = vmax.f32 %v157_v22, 0.0  ;;  %v210_v41 = vmax.f32 %v200_v34, 0.0  ;;  %v204_v42 = vadd.f32 %v203_v39, %v64_v24  ;;  %v205_v43 = vpop.f32.mrb[3].mxu1  ;;  %v1942_v17 = vld [vmem:[#allocation2 + $0x2ec] ss:$16 sps:$4 sm:$0xff]  }
  0xf3   :  { %v163_v30 = vadd.f32 %v162_v29, %v60_v19  ;;  %v209_v36 = vmax.f32 %v159_v25, 0.0  ;;  %v211_v47 = vmax.f32 %v202_v38, 0.0  ;;  %v206_v48 = vadd.f32 %v205_v43, %v68_v27  ;;  %v1937_v19 = vld [vmem:[#allocation2 + $0x2e0] ss:$16 sps:$4 sm:$0xff]   ;;  %v1945_v22 = vld [vmem:[#allocation2 + $0x304] ss:$16 sps:$4 sm:$0xff]  }
  0xf4   :  { %v212_v33 = vmax.f32 %v161_v28, 0.0  ;;  %v214_v51 = vmax.f32 %v204_v42, 0.0  ;;  %v1943_v24 = vld [vmem:[#allocation2 + $0x300] ss:$16 sps:$4 sm:$0xff]   ;;  %v1946_v25 = vld [vmem:[#allocation2 + $0x308] ss:$16 sps:$4 sm:$0xff]  }
  0xf5   :  { %v213_v37 = vmax.f32 %v163_v30, 0.0  ;;  %v215_v52 = vmax.f32 %v206_v48, 0.0  ;;  %v1951_v26 = vld [vmem:[#allocation2 + $0x324] ss:$16 sps:$4 sm:$0xff]   ;;  %v1954_v27 = vld [vmem:[#allocation2 + $0x32c] ss:$16 sps:$4 sm:$0xff]  }
  0xf6   :  { %v216_v40 = vpack.c.bf16 %v212_v33, %v208_v32  ;;  %v2150_v53 = vpack.c.bf16 %v214_v51, %v210_v41  ;;  %v1949_v28 = vld [vmem:[#allocation2 + $0x320] ss:$16 sps:$4 sm:$0xff]   ;;  %v1952_v29 = vld [vmem:[#allocation2 + $0x328] ss:$16 sps:$4 sm:$0xff]   ;;  %v1957_v30 = vld [vmem:[#allocation2 + $0x344] ss:$16 sps:$4 sm:$0xff]  }
  0xf7   :  { %v217_v44 = vpack.c.bf16 %v213_v37, %v209_v36  ;;  %v219_v56 = vpack.c.bf16 %v215_v52, %v211_v47  ;;  %v1955_v32 = vld [vmem:[#allocation2 + $0x340] ss:$16 sps:$4 sm:$0xff]   ;;  %v1958_v33 = vld [vmem:[#allocation2 + $0x348] ss:$16 sps:$4 sm:$0xff]   ;;  %v1963_v34 = vld [vmem:[#allocation2 + $0x364] ss:$16 sps:$4 sm:$0xff]  }
  0xf8   :  { %v1966_v35 = vld [vmem:[#allocation2 + $0x36c] ss:$16 sps:$4 sm:$0xff]   ;;  %v1961_v36 = vld [vmem:[#allocation2 + $0x360] ss:$16 sps:$4 sm:$0xff]   ;;  %v1964_v37 = vld [vmem:[#allocation2 + $0x368] ss:$16 sps:$4 sm:$0xff]  }
  0xf9   :  { %1042 = vmatprep.mubr.bf16.mxu0 %v217_v44  ;;  %1128 = vmatprep.mubr.bf16.mxu1 %v217_v44  ;;  %v1969_v38 = vld [vmem:[#allocation2 + $0x384] ss:$16 sps:$4 sm:$0xff]   ;;  %v1972_v39 = vld [vmem:[#allocation2 + $0x38c] ss:$16 sps:$4 sm:$0xff]   ;;  %v1970_v41 = vld [vmem:[#allocation2 + $0x388] ss:$16 sps:$4 sm:$0xff]  }
  0xfa   :  { %1043 = vmatmul.mubr.bf16.vlgmr.msra.gmra.mrb[4].mxu0 %v216_v40  ;;  %1129 = vmatmul.mubr.bf16.vlgmr.msra.gmra.mrb[4].mxu1 %v216_v40  ;;  %v1967_v40 = vld [vmem:[#allocation2 + $0x380] ss:$16 sps:$4 sm:$0xff]   ;;  %v1975_v42 = vld [vmem:[#allocation2 + $0x3a4] ss:$16 sps:$4 sm:$0xff]   ;;  %v1978_v43 = vld [vmem:[#allocation2 + $0x3ac] ss:$16 sps:$4 sm:$0xff]  }
  0xfb   :  { %1054 = vmatpush1.bf16.msra.mxu0 %v1895_v45  ;;  %1140 = vmatpush1.bf16.msra.mxu1 %v1898_v46  ;;  %v1973_v44 = vld [vmem:[#allocation2 + $0x3a0] ss:$16 sps:$4 sm:$0xff]   ;;  %v1976_v45 = vld [vmem:[#allocation2 + $0x3a8] ss:$16 sps:$4 sm:$0xff]   ;;  %v1981_v46 = vld [vmem:[#allocation2 + $0x3c4] ss:$16 sps:$4 sm:$0xff]  }
  0xfc   :  { %1055 = vmatprep.subr.bf16.mxu0 %v1903_v49  ;;  %1141 = vmatprep.subr.bf16.mxu1 %v1906_v50  ;;  %v1984_v47 = vld [vmem:[#allocation2 + $0x3cc] ss:$16 sps:$4 sm:$0xff]   ;;  %v1979_v48 = vld [vmem:[#allocation2 + $0x3c0] ss:$16 sps:$4 sm:$0xff]   ;;  %v1982_v49 = vld [vmem:[#allocation2 + $0x3c8] ss:$16 sps:$4 sm:$0xff]  }
  0xfd   :  { %1085 = vmatprep.mubr.bf16.mxu0 %v219_v56  ;;  %1171 = vmatprep.mubr.bf16.mxu1 %v219_v56  ;;  %v1987_v50 = vld [vmem:[#allocation2 + $0x3e4] ss:$16 sps:$4 sm:$0xff]   ;;  %v1990_v51 = vld [vmem:[#allocation2 + $0x3ec] ss:$16 sps:$4 sm:$0xff]   ;;  %v1985_v52 = vld [vmem:[#allocation2 + $0x3e0] ss:$16 sps:$4 sm:$0xff]  }
  0xfe   :  { %v1992_v56 = vld [vmem:[%s2281_s5 + $0xc0] sm:$0xff]  }
  0xff   :  { %1056 = vmatpush1.bf16.msra.mxu0 %v1901_v54  ;;  %1142 = vmatpush1.bf16.msra.mxu1 %v1904_v55  ;;  %v1988_v54 = vld [vmem:[#allocation2 + $0x3e8] ss:$16 sps:$4 sm:$0xff]   ;;  %v1991_v55 = vld [vmem:[%s2281_s5 + $0x40] sm:$0xff]  }
 0x100   :  { %1057 = vmatprep.subr.bf16.mxu0 %v1909_v57  ;;  %1143 = vmatprep.subr.bf16.mxu1 %v1912_v58  ;;  %v1993_v57 = vld [vmem:[%s2281_s5] sm:$0xff]  }
 0x101   :  { %v1994_v58 = vld [vmem:[%s2281_s5 + $0x80] sm:$0xff]  }
 0x103   :  { %1058 = vmatpush1.bf16.msra.mxu0 %v1907_v59  ;;  %1144 = vmatpush1.bf16.msra.mxu1 %v1910_v60  ;;  %v1995_v59 = vld [vmem:[%s2281_s5 + $0x48] sm:$0xff]  }
 0x104   :  { %1059 = vmatprep.subr.bf16.mxu0 %v1915_v61  ;;  %1145 = vmatprep.subr.bf16.mxu1 %v1918_v62  ;;  %v1996_v60 = vld [vmem:[%s2281_s5 + $0xc8] sm:$0xff]  }
 0x105   :  { %v1997_v61 = vld [vmem:[%s2281_s5 + $0x8] sm:$0xff]  }
 0x106   :  { %v1998_v62 = vld [vmem:[%s2281_s5 + $0x88] sm:$0xff]  }
 0x107   :  { %1060 = vmatpush1.bf16.msra.mxu0 %v1913_v63  ;;  %1146 = vmatpush1.bf16.msra.mxu1 %v1916_v0  ;;  %v1999_v63 = vld [vmem:[%s2281_s5 + $0x50] sm:$0xff]  }
 0x108   :  { %1061 = vmatprep.subr.bf16.mxu0 %v1921_v1  ;;  %1147 = vmatprep.subr.bf16.mxu1 %v1924_v2  ;;  %v2001_v0 = vld [vmem:[%s2281_s5 + $0x10] sm:$0xff]   ;;  %v2003_v2 = vld [vmem:[%s2281_s5 + $0x58] sm:$0xff]  }
 0x109   :  { %v2002_v1 = vld [vmem:[%s2281_s5 + $0x90] sm:$0xff]  }
 0x10b   :  { %1062 = vmatpush1.bf16.msra.mxu0 %v1919_v3  ;;  %1148 = vmatpush1.bf16.msra.mxu1 %v1922_v4  ;;  %v2004_v3 = vld [vmem:[%s2281_s5 + $0xd8] sm:$0xff]  }
 0x10c   :  { %1063 = vmatprep.subr.bf16.mxu0 %v1927_v5  ;;  %1149 = vmatprep.subr.bf16.mxu1 %v1930_v6  ;;  %v2005_v4 = vld [vmem:[%s2281_s5 + $0x18] sm:$0xff]   ;;  %v2007_v6 = vld [vmem:[%s2281_s5 + $0x60] sm:$0xff]  }
 0x10d   :  { %v2006_v5 = vld [vmem:[%s2281_s5 + $0x98] sm:$0xff]  }
 0x10f   :  { %1064 = vmatpush1.bf16.msra.mxu0 %v1925_v7  ;;  %1150 = vmatpush1.bf16.msra.mxu1 %v1928_v8  ;;  %v2008_v7 = vld [vmem:[%s2281_s5 + $0xe0] sm:$0xff]  }
 0x110   :  { %1065 = vmatprep.subr.bf16.mxu0 %v1933_v9  ;;  %1151 = vmatprep.subr.bf16.mxu1 %v1936_v10  ;;  %v2009_v8 = vld [vmem:[%s2281_s5 + $0x20] sm:$0xff]   ;;  %v2011_v10 = vld [vmem:[%s2281_s5 + $0x68] sm:$0xff]  }
 0x111   :  { %v2010_v9 = vld [vmem:[%s2281_s5 + $0xa0] sm:$0xff]  }
 0x113   :  { %1066 = vmatpush1.bf16.msra.mxu0 %v1931_v11  ;;  %1152 = vmatpush1.bf16.msra.mxu1 %v1934_v12  ;;  %v2012_v11 = vld [vmem:[%s2281_s5 + $0xe8] sm:$0xff]  }
 0x114   :  { %1067 = vmatprep.subr.bf16.mxu0 %v1939_v15  ;;  %1153 = vmatprep.subr.bf16.mxu1 %v1942_v17  ;;  %v2013_v12 = vld [vmem:[%s2281_s5 + $0x28] sm:$0xff]   ;;  %v2015_v17 = vld [vmem:[%s2281_s5 + $0x70] sm:$0xff]  }
 0x115   :  { %v2014_v15 = vld [vmem:[%s2281_s5 + $0xa8] sm:$0xff]  }
 0x117   :  { %1068 = vmatpush1.bf16.msra.mxu0 %v1937_v19  ;;  %1154 = vmatpush1.bf16.msra.mxu1 %v1940_v21  ;;  %v2016_v19 = vld [vmem:[%s2281_s5 + $0xf0] sm:$0xff]  }
 0x118   :  { %1069 = vmatprep.subr.bf16.mxu0 %v1945_v22  ;;  %1155 = vmatprep.subr.bf16.mxu1 %v1948_v23  ;;  %v2017_v21 = vld [vmem:[%s2281_s5 + $0x30] sm:$0xff]   ;;  %v2019_v23 = vld [vmem:[%s2281_s5 + $0x78] sm:$0xff]  }
 0x119   :  { %v2018_v22 = vld [vmem:[%s2281_s5 + $0xb0] sm:$0xff]  }
 0x11b   :  { %1070 = vmatpush1.bf16.msra.mxu0 %v1943_v24  ;;  %1156 = vmatpush1.bf16.msra.mxu1 %v1946_v25  ;;  %v2020_v24 = vld [vmem:[%s2281_s5 + $0xf8] sm:$0xff]  }
 0x11c   :  { %1071 = vmatprep.subr.bf16.mxu0 %v1951_v26  ;;  %1157 = vmatprep.subr.bf16.mxu1 %v1954_v27  ;;  %v2021_v25 = vld [vmem:[%s2281_s5 + $0x38] sm:$0xff]   ;;  %v348_v27 = vld [vmem:[%s2280_s4] sm:$0xf] }
 0x11d   :  { %v2022_v26 = vld [vmem:[%s2281_s5 + $0xb8] sm:$0xff]  }
 0x11f   :  { %1072 = vmatpush1.bf16.msra.mxu0 %v1949_v28  ;;  %1158 = vmatpush1.bf16.msra.mxu1 %v1952_v29  ;;  %v353_v28 = vrot.slane %v348_v27, %v55_v14  ;;  %v361_v29 = vrot.slane %v348_v27, %v63_v18 }
 0x120   :  { %1073 = vmatprep.subr.bf16.mxu0 %v1957_v30  ;;  %1159 = vmatprep.subr.bf16.mxu1 %v1960_v31  ;;  %v357_v30 = vrot.slane %v348_v27, %v59_v16  ;;  %v365_v31 = vrot.slane %v348_v27, %v67_v20 }
 0x123   :  { %1074 = vmatpush1.bf16.msra.mxu0 %v1955_v32  ;;  %1160 = vmatpush1.bf16.msra.mxu1 %v1958_v33 }
 0x124   :  { %1075 = vmatprep.subr.bf16.mxu0 %v1963_v34  ;;  %1161 = vmatprep.subr.bf16.mxu1 %v1966_v35 }
 0x127   :  { %1076 = vmatpush1.bf16.msra.mxu0 %v1961_v36  ;;  %1162 = vmatpush1.bf16.msra.mxu1 %v1964_v37 }
 0x128   :  { %1077 = vmatprep.subr.bf16.mxu0 %v1969_v38  ;;  %1163 = vmatprep.subr.bf16.mxu1 %v1972_v39 }
 0x12b   :  { %1078 = vmatpush1.bf16.msra.mxu0 %v1967_v40  ;;  %1164 = vmatpush1.bf16.msra.mxu1 %v1970_v41 }
 0x12c   :  { %1079 = vmatprep.subr.bf16.mxu0 %v1975_v42  ;;  %1165 = vmatprep.subr.bf16.mxu1 %v1978_v43 }
 0x12f   :  { %1080 = vmatpush1.bf16.msra.mxu0 %v1973_v44  ;;  %1166 = vmatpush1.bf16.msra.mxu1 %v1976_v45 }
 0x130   :  { %1081 = vmatprep.subr.bf16.mxu0 %v1981_v46  ;;  %1167 = vmatprep.subr.bf16.mxu1 %v1984_v47 }
 0x133   :  { %1082 = vmatpush1.bf16.msra.mxu0 %v1979_v48  ;;  %1168 = vmatpush1.bf16.msra.mxu1 %v1982_v49 }
 0x134   :  { %1083 = vmatprep.subr.bf16.mxu0 %v1987_v50  ;;  %1169 = vmatprep.subr.bf16.mxu1 %v1990_v51 }
 0x137   :  { %1084 = vmatpush1.bf16.msra.mxu0 %v1985_v52  ;;  %1170 = vmatpush1.bf16.msra.mxu1 %v1988_v54 }
 0x138   :  { %1721 = vmatprep.subr.bf16.mxu0 %v1991_v55  ;;  %1743 = vmatprep.subr.bf16.mxu1 %v1992_v56  ;;  %v2051_v56 = vmov 0.0  }
 0x139   :  { %1539 = vst [vmem:[%s2283_s7] sm:$0xff] %v2051_v56  ;;  %1540 = vst [vmem:[%s2283_s7 + $0x8] sm:$0xff] %v2051_v56 }
 0x13a   :  { %1086 = vmatmul.mubr.bf16.vlgmr.msra.gmra.mrb[4].mxu0 %v2150_v53  ;;  %1172 = vmatmul.mubr.bf16.vlgmr.msra.gmra.mrb[4].mxu1 %v2150_v53  ;;  %v2000_v53 = vld [vmem:[%s2281_s5 + $0xd0] sm:$0xff]  }
 0x13b   :  { %1722 = vmatpush3.bf16.msra.mxu0 %v1993_v57  ;;  %1744 = vmatpush3.bf16.msra.mxu1 %v1994_v58 }
 0x13c   :  { %1723 = vmatprep.subr.bf16.mxu0 %v1995_v59  ;;  %1745 = vmatprep.subr.bf16.mxu1 %v1996_v60  ;;  %v1688_v59 = vld [vmem:[%s2282_s6] ss:$0 sm:$0xff] }
 0x13f   :  { %1724 = vmatpush3.bf16.msra.mxu0 %v1997_v61  ;;  %1746 = vmatpush3.bf16.msra.mxu1 %v1998_v62 }
 0x140   :  { %1725 = vmatprep.subr.bf16.mxu0 %v1999_v63  ;;  %1747 = vmatprep.subr.bf16.mxu1 %v2000_v53 }
 0x143   :  { %1726 = vmatpush3.bf16.msra.mxu0 %v2001_v0  ;;  %1748 = vmatpush3.bf16.msra.mxu1 %v2002_v1 }
 0x144   :  { %1727 = vmatprep.subr.bf16.mxu0 %v2003_v2  ;;  %1749 = vmatprep.subr.bf16.mxu1 %v2004_v3 }
 0x147   :  { %1728 = vmatpush3.bf16.msra.mxu0 %v2005_v4  ;;  %1750 = vmatpush3.bf16.msra.mxu1 %v2006_v5 }
 0x148   :  { %1729 = vmatprep.subr.bf16.mxu0 %v2007_v6  ;;  %1751 = vmatprep.subr.bf16.mxu1 %v2008_v7 }
 0x14b   :  { %1730 = vmatpush3.bf16.msra.mxu0 %v2009_v8  ;;  %1752 = vmatpush3.bf16.msra.mxu1 %v2010_v9 }
 0x14c   :  { %1731 = vmatprep.subr.bf16.mxu0 %v2011_v10  ;;  %1753 = vmatprep.subr.bf16.mxu1 %v2012_v11 }
 0x14f   :  { %1732 = vmatpush3.bf16.msra.mxu0 %v2013_v12  ;;  %1754 = vmatpush3.bf16.msra.mxu1 %v2014_v15 }
 0x150   :  { %1733 = vmatprep.subr.bf16.mxu0 %v2015_v17  ;;  %1755 = vmatprep.subr.bf16.mxu1 %v2016_v19 }
 0x153   :  { %1734 = vmatpush3.bf16.msra.mxu0 %v2017_v21  ;;  %1756 = vmatpush3.bf16.msra.mxu1 %v2018_v22 }
 0x154   :  { %1735 = vmatprep.subr.bf16.mxu0 %v2019_v23  ;;  %1757 = vmatprep.subr.bf16.mxu1 %v2020_v24 }
 0x157   :  { %1736 = vmatpush3.bf16.msra.mxu0 %v2021_v25  ;;  %1758 = vmatpush3.bf16.msra.mxu1 %v2022_v26 }
 0x20d   :  { %v1087_v32 = vpop.f32.mrb[4].mxu0  ;;  %v1173_v33 = vpop.f32.mrb[4].mxu1 }
 0x20e   :  { %v1765_v34 = vadd.f32 %v1087_v32, %v353_v28  ;;  %v1769_v35 = vadd.f32 %v1173_v33, %v361_v29  ;;  %v1089_v36 = vpop.f32.mrb[5].mxu0  ;;  %v1175_v37 = vpop.f32.mrb[5].mxu1 }
 0x20f   :  { %v1766_v38 = vadd.f32 %v1089_v36, %v357_v30  ;;  %v1770_v39 = vadd.f32 %v1175_v37, %v365_v31  ;;  %v1091_v40 = vpop.f32.mrb[6].mxu0  ;;  %v1177_v41 = vpop.f32.mrb[6].mxu1 }
 0x210   :  { %v1767_v14 = vadd.f32 %v1091_v40, %v353_v28  ;;  %v1771_v42 = vadd.f32 %v1177_v41, %v361_v29  ;;  %v1093_v43 = vpop.f32.mrb[7].mxu0  ;;  %v1179_v18 = vpop.f32.mrb[7].mxu1  ;;  %v1182_v16 = vmax.f32 %v1765_v34, 0.0  ;;  %v1184_v46 = vmax.f32 %v1769_v35, 0.0 }
 0x211   :  { %v1768_v44 = vadd.f32 %v1093_v43, %v357_v30  ;;  %v1772_v45 = vadd.f32 %v1179_v18, %v365_v31  ;;  %v1183_v47 = vmax.f32 %v1766_v38, 0.0  ;;  %v1185_v48 = vmax.f32 %v1770_v39, 0.0 }
 0x212   :  { %v1186_v13 = vmax.f32 %v1767_v14, 0.0  ;;  %v1188_v20 = vmax.f32 %v1771_v42, 0.0 }
 0x213   :  { %v1187_v49 = vmax.f32 %v1768_v44, 0.0  ;;  %v1189_v50 = vmax.f32 %v1772_v45, 0.0 }
 0x214   :  { %v1190_v51 = vpack.c.bf16 %v1186_v13, %v1182_v16  ;;  %v1192_v52 = vpack.c.bf16 %v1188_v20, %v1184_v46 }
 0x215   :  { %v1191_v54 = vpack.c.bf16 %v1187_v49, %v1183_v47  ;;  %v1193_v55 = vpack.c.bf16 %v1189_v50, %v1185_v48 }
 0x217   :  { %1489 = vmatprep.mubr.bf16.mxu0 %v1191_v54  ;;  %1530 = vmatprep.mubr.bf16.mxu1 %v1193_v55 }
 0x218   :  { %1490 = vmatmul.mubr.bf16.vlgmr.msra.gmra.mrb[8].mxu0 %v1190_v51  ;;  %1531 = vmatmul.mubr.bf16.vlgmr.msra.gmra.mrb[8].mxu1 %v1192_v52 }
 0x2eb   :  { %v1737_v57 = vpop.f32.mrb[8].mxu0  ;;  %v1759_v58 = vpop.f32.mrb[8].mxu1 }
 0x2ec   :  { %v1738_v60 = vpop.f32.mrb[9].mxu0  ;;  %v1760_v61 = vpop.f32.mrb[9].mxu1 }
 0x2ed   :  { %v1739_v62 = vadd.f32 %v1738_v60, %v1737_v57  ;;  %v1761_v63 = vadd.f32 %v1760_v61, %v1759_v58  ;;  %v1740_v53 = vpop.f32.mrb[10].mxu0  ;;  %v1762_v0 = vpop.f32.mrb[10].mxu1 }
 0x2ee   :  { %v1741_v1 = vpop.f32.mrb[11].mxu0  ;;  %v1763_v2 = vpop.f32.mrb[11].mxu1 }
 0x2ef   :  { %v1492_v3 = vadd.f32 %v1739_v62, %v1688_v59  ;;  %v1742_v4 = vadd.f32 %v1741_v1, %v1740_v53  ;;  %v1764_v5 = vadd.f32 %v1763_v2, %v1762_v0 }
 0x2f1   :  { %v1533_v6 = vadd.f32 %v1761_v63, %v1492_v3  ;;  %v1495_v7 = vadd.f32 %v1742_v4, %v1688_v59 }
 0x2f3   :  { %1542 = vst.msk [vmem:[%s2283_s7] sm:$0xff] %vm1541_vm1, %v1533_v6  ;;  %v1536_v8 = vadd.f32 %v1764_v5, %v1495_v7 }
 0x2f5   :  { %1543 = vst.msk [vmem:[%s2283_s7 + $0x8] sm:$0xff] %vm1541_vm1, %v1536_v8 }
 0x2f6   :  { %1548 = vsyncpa [#allocation3], 1 }

</bundles_post_ra>
